<compile_context>
chip_gen: v7x
topology: tpu7x:2x2x1
jax: 0.10.0
libtpu: 0.0.40
codegen_flags: <defaults>
</compile_context>

<pallas_src>
import math

import numpy as np
import jax
import jax.numpy as jnp
from jax import lax
from jax.experimental import pallas as pl
from jax.experimental.pallas import tpu as pltpu

COORD_DIM = 2          # the module's FFN wiring assumes 2-D coords
FREQ_NUM = 16
SPA_EMBED_DIM = 32
MAX_RADIUS = 0.01
MIN_RADIUS = 1e-5


def geometric_freq_list(frequency_num, max_radius, min_radius):
    # mirrors _cal_freq_list(freq_init='geometric')
    log_inc = math.log(float(max_radius) / float(min_radius)) / (frequency_num * 1.0 - 1)
    timescales = min_radius * np.exp(
        np.arange(frequency_num, dtype=np.float32) * log_inc)
    return (1.0 / timescales).astype(np.float32)


def _round_up(x, m):
    return -(-x // m) * m


# ----------------------------- Pallas kernels ------------------------------

def _packed_sincos(cp, f_row):
    """Unique phases + sin/cos on packed rows.

    cp:    (tile_g, 2*group) packed coords [x0, y0, x1, y1, ...].
    f_row: (1, F) frequencies.
    Returns (tile_g, group*4F) laid out as [all sins | all coses]; within each
    half, the column for (point p, axis a, freq f) is 2F*p + F*a + f.
    Phases are exact f32 (VPU multiplies only); each unique phase gets exactly
    one sin and one cos, evaluated on lane-dense slabs.
    """
    F = f_row.shape[-1]
    slabs = [cp[:, c:c + 1] * f_row for c in range(cp.shape[1])]
    ph = jnp.concatenate(slabs, axis=-1)                      # (tile_g, group*2F)
    del F
    return jnp.concatenate([jnp.sin(ph), jnp.cos(ph)], axis=-1)


def gridcell_ffn_kernel(freq_ref, coords_ref, w_ref, b_ref, out_ref):
    """Fused sin/cos embedding + Linear + ReLU, row-packed lane-dense layout.

    coords_ref: (tile_g, 2*group) packed coordinate rows.
    w_ref:      (group*4F, group*d_out) block-diagonal weights matching the
                [all sins | all coses] packed embed (see _pack_ffn_params).
    b_ref:      (1, group*d_out) tiled bias.
    out_ref:    (tile_g, group*d_out) packed Linear+ReLU outputs (128 lanes).
    """
    emb = _packed_sincos(coords_ref[...], freq_ref[...])      # (tile_g, group*4F)
    out = jnp.dot(emb, w_ref[...], preferred_element_type=jnp.float32)
    out_ref[...] = jnp.maximum(out + b_ref[...], 0.0)         # ReLU


def gridcell_embed_kernel(freq_ref, coords_ref, perm_ref, out_ref):
    """Embed-only path (ffn=None): sin/cos once each on unique phases, then a
    0/1 permutation matmul on the idle MXU emits the torch-interleaved
    [coord, freq, sin|cos] column order directly (lane-dense, no jnp.where)."""
    sc = _packed_sincos(coords_ref[...], freq_ref[...])       # (tile_g, group*4F)
    out_ref[...] = jnp.dot(sc, perm_ref[...], preferred_element_type=jnp.float32)


# ------------------------- host-side packing helpers -------------------------

def _pack_ffn_params(w_torch, b, F, group):
    """Pack nn.Linear params for the packed-row kernel.

    w_torch: (d_out, 4F) nn.Linear weight (torch layout, torch column order
             [coord, freq, sin|cos]).
    Returns block-diagonal (group*4F, group*d_out) weights whose row order
    matches the kernel's [all sins | all coses] packed embed, plus the tiled
    bias.  One-time host-side numpy prep.
    """
    d_out, d_in = w_torch.shape
    assert d_in == 4 * F
    wt = np.asarray(w_torch, np.float32).T                    # (4F, d_out)
    K, Nc = group * 4 * F, group * d_out
    w_big = np.zeros((K, Nc), np.float32)
    for p in range(group):
        for a in range(2):
            for f in range(F):
                sin_row = 2 * F * p + F * a + f
                cos_row = 2 * F * group + sin_row
                w_big[sin_row, d_out * p:d_out * (p + 1)] = wt[2 * F * a + 2 * f + 0]
                w_big[cos_row, d_out * p:d_out * (p + 1)] = wt[2 * F * a + 2 * f + 1]
    b_big = np.tile(np.asarray(b, np.float32).reshape(-1), group).reshape(1, Nc)
    return jnp.asarray(w_big), jnp.asarray(b_big)


def _make_embed_perm(F, group):
    """0/1 matrix mapping the kernel's [all sins | all coses] packed layout to
    the torch-interleaved output columns (per point: a*2F + 2f + {sin:0,cos:1})."""
    K = group * 4 * F
    P = np.zeros((K, K), np.float32)
    for p in range(group):
        for a in range(2):
            for f in range(F):
                src_sin = 2 * F * p + F * a + f
                dst = 4 * F * p + 2 * F * a + 2 * f
                P[src_sin, dst] = 1.0
                P[2 * F * group + src_sin, dst + 1] = 1.0
    return jnp.asarray(P)


def _choose_tiling(n_groups, max_tile=1024):
    """Pick (row-groups per grid step, padded total row-groups).

    Large tiles amortize the ~0.35us/step pipeline overhead; when more than
    one step is needed the step count is forced even so v7x's two TensorCores
    (which shard the 'parallel' grid axis) split the work evenly.  Footprint
    at tile_g=1024 is only a few MiB -- far below the scoped-VMEM limits on
    v5e/v6e (16 MiB default / 128 MiB physical) and v7x (32 / 64 MiB)."""
    if n_groups < 128:
        t = _round_up(max(n_groups, 8), 8)
        return t, t
    steps = max(2, -(-n_groups // max_tile))
    if steps % 2:
        steps += 1
    t = _round_up(-(-n_groups // steps), 8)
    return t, t * steps


# ------------------------------- wrapper ------------------------------------

def gridcell_spatial_relation_encoder(coords, freq_list, w_torch=None, b=None,
                                      use_ffn=True, max_tile_groups=1024):
    """coords: (B, N, 2) f32.  w_torch: (spa_embed_dim, 4F) nn.Linear weight.
    Returns (B, N, spa_embed_dim) if use_ffn else (B, N, 4F) in torch order."""
    B, N, C = coords.shape
    assert C == COORD_DIM, "the module's FFN wiring assumes 2-D coords"
    F = int(freq_list.shape[0])
    d_in = 2 * C * F                                           # 4F
    M = B * N

    if use_ffn:
        d_out = int(w_torch.shape[0])
        # group points so a packed output row is a 128-lane multiple (4 for 32).
        # If d_out does not divide 128 this degrades to group=1 (masked stores,
        # still correct).
        group = 128 // d_out if 128 % d_out == 0 else 1
    else:
        d_out = d_in
        # group so the unique-phase slab is a full 128-lane vreg (4 for F=16)
        # and the packed output row is 2x128 lanes.
        group = 128 // (C * F) if 128 % (C * F) == 0 else 1

    n_groups = -(-M // group)
    tile_g, ng_pad = _choose_tiling(n_groups, max_tile_groups)
    m_pad = ng_pad * group

    # Free row-major reinterpretation: (m_pad, 2) -> (ng_pad, 2*group).
    flat = coords.reshape(M, C).astype(jnp.float32)
    if m_pad != M:
        flat = jnp.pad(flat, ((0, m_pad - M), (0, 0)))         # zero rows -> finite, sliced off
    coords_packed = flat.reshape(ng_pad, group * C)

    grid = (ng_pad // tile_g,)
    freq_row = jnp.asarray(np.asarray(freq_list, np.float32).reshape(1, F))
    freq_spec = pl.BlockSpec((1, F), lambda i: (0, 0))                 # resident
    coords_spec = pl.BlockSpec((tile_g, group * C), lambda i: (i, 0))
    out_spec = pl.BlockSpec((tile_g, group * d_out), lambda i: (i, 0))
    cparams = pltpu.CompilerParams(
        dimension_semantics=("parallel",),
        vmem_limit_bytes=32 * 1024 * 1024)

    if use_ffn:
        w_big, b_big = _pack_ffn_params(w_torch, b, F, group)
        out_packed = pl.pallas_call(
            gridcell_ffn_kernel,
            out_shape=jax.ShapeDtypeStruct((ng_pad, group * d_out), jnp.float32),
            grid_spec=pltpu.PrefetchScalarGridSpec(
                num_scalar_prefetch=0,
                grid=grid,
                in_specs=[freq_spec, coords_spec,
                          # constant index_map -> weights/bias stay VMEM-resident
                          pl.BlockSpec((group * d_in, group * d_out), lambda i: (0, 0)),
                          pl.BlockSpec((1, group * d_out), lambda i: (0, 0))],
                out_specs=out_spec),
            compiler_params=cparams,
        )(freq_row, coords_packed, w_big, b_big)
    else:
        perm = _make_embed_perm(F, group)
        out_packed = pl.pallas_call(
            gridcell_embed_kernel,
            out_shape=jax.ShapeDtypeStruct((ng_pad, group * d_out), jnp.float32),
            grid_spec=pltpu.PrefetchScalarGridSpec(
                num_scalar_prefetch=0,
                grid=grid,
                in_specs=[freq_spec, coords_spec,
                          pl.BlockSpec((group * d_in, group * d_in), lambda i: (0, 0))],
                out_specs=out_spec),
            compiler_params=cparams,
        )(freq_row, coords_packed, perm)

    # Free reinterpretation back to per-row layout; slice only if we padded.
    out = out_packed.reshape(m_pad, d_out)
    if m_pad != M:
        out = out[:M]
    return out.reshape(B, N, d_out)


# --------------------------- pure-JAX reference ------------------------------

def reference(coords, freq_list, w_torch, b, use_ffn=True):
    B, N, _ = coords.shape
    F = int(freq_list.shape[0])
    c = jnp.tile(coords[..., None, None], (1, 1, 1, F, 2))          # (B,N,2,F,2)
    freq_mat = jnp.tile(jnp.asarray(freq_list, jnp.float32)[:, None], (1, 2))
    spr = c * freq_mat
    spr = jnp.stack([jnp.sin(spr[..., 0]), jnp.cos(spr[..., 1])], axis=-1)
    spr = spr.reshape(B, N, -1)                                     # (B,N,4F) torch order
    if not use_ffn:
        return spr
    out = jnp.dot(spr, jnp.asarray(w_torch, jnp.float32).T,
                  precision=lax.Precision.HIGHEST) + jnp.asarray(b, jnp.float32)
    return jnp.maximum(out, 0.0)                                    # ReLU


# ---------------------------------- main -------------------------------------

if __name__ == "__main__":
    key = jax.random.PRNGKey(0)
    k_coord, k_w, k_b = jax.random.split(key, 3)

    B, N = 2, 8
    d_in = COORD_DIM * FREQ_NUM * 2          # 64
    d_out = SPA_EMBED_DIM                    # 32

    coords = jax.random.uniform(
        k_coord, (B, N, COORD_DIM), jnp.float32,
        minval=-MAX_RADIUS, maxval=MAX_RADIUS)

    freq_list = geometric_freq_list(FREQ_NUM, MAX_RADIUS, MIN_RADIUS)

    # deterministic parameter init (xavier_uniform weight, default linear bias)
    bound_w = math.sqrt(6.0 / (d_in + d_out))
    w_torch = jax.random.uniform(k_w, (d_out, d_in), jnp.float32,
                                 minval=-bound_w, maxval=bound_w)
    bound_b = 1.0 / math.sqrt(d_in)
    b = jax.random.uniform(k_b, (d_out,), jnp.float32,
                           minval=-bound_b, maxval=bound_b)

    # ffn path (sin/cos embed + Linear + ReLU fused into the kernel)
    out_ffn = gridcell_spatial_relation_encoder(
        coords, freq_list, w_torch, b, use_ffn=True)
    out_ffn = jax.block_until_ready(out_ffn)
    ref_ffn = reference(coords, freq_list, w_torch, b, use_ffn=True)

    # ffn=None path (just the sin/cos embedding, torch column order)
    out_emb = gridcell_spatial_relation_encoder(
        coords, freq_list, w_torch, b, use_ffn=False)
    out_emb = jax.block_until_ready(out_emb)
    ref_emb = reference(coords, freq_list, w_torch, b, use_ffn=False)

    assert out_ffn.shape == (B, N, d_out)
    assert out_emb.shape == (B, N, d_in)
    # Tolerance leaves margin for sin/cos implementation differences between
    # the Mosaic and XLA lowerings at phases up to ~max_radius/min_radius
    # (~1e3 rad); typical agreement is ~1e-6.
    np.testing.assert_allclose(np.asarray(out_ffn), np.asarray(ref_ffn),
                               rtol=1e-4, atol=1e-4)
    np.testing.assert_allclose(np.asarray(out_emb), np.asarray(ref_emb),
                               rtol=1e-4, atol=1e-4)
    print("KERNEL_OK")
</pallas_src>

<mosaic_0001>
module attributes {stable_mosaic.version = 11 : i64} {
  func.func @gridcell_ffn_kernel(%arg0: i32, %arg1: memref<1x16xf32, #tpu.memory_space<vmem>>, %arg2: memref<8x8xf32, #tpu.memory_space<vmem>>, %arg3: memref<256x128xf32, #tpu.memory_space<vmem>>, %arg4: memref<1x128xf32, #tpu.memory_space<vmem>>, %arg5: memref<8x128xf32, #tpu.memory_space<vmem>>) attributes {dimension_semantics = [#tpu.dimension_semantics<parallel>], iteration_bounds = array<i64: 1>, scalar_prefetch = 0 : i64, scratch_operands = 0 : i64, tpu.core_type = #tpu.core_type<tc>, window_params = [{pipeline_mode = #tpu.pipeline_mode<synchronous>, transform_indices = @transform_0, window_bounds = array<i64: 1, 16>}, {transform_indices = @transform_1, window_bounds = array<i64: 8, 8>}, {pipeline_mode = #tpu.pipeline_mode<synchronous>, transform_indices = @transform_2, window_bounds = array<i64: 256, 128>}, {pipeline_mode = #tpu.pipeline_mode<synchronous>, transform_indices = @transform_3, window_bounds = array<i64: 1, 128>}, {transform_indices = @transform_4, window_bounds = array<i64: 8, 128>}]} {
    %c0 = arith.constant 0 : index
    %c0_0 = arith.constant 0 : index
    %0 = vector.load %arg2[%c0, %c0_0] : memref<8x8xf32, #tpu.memory_space<vmem>>, vector<8x8xf32>
    %c0_1 = arith.constant 0 : index
    %c0_2 = arith.constant 0 : index
    %1 = vector.load %arg1[%c0_1, %c0_2] : memref<1x16xf32, #tpu.memory_space<vmem>>, vector<1x16xf32>
    %2 = vector.extract_strided_slice %0 {offsets = [0, 0], sizes = [8, 1], strides = [1, 1]} : vector<8x8xf32> to vector<8x1xf32>
    %3 = vector.broadcast %2 : vector<8x1xf32> to vector<8x16xf32>
    %4 = vector.broadcast %1 : vector<1x16xf32> to vector<8x16xf32>
    %5 = arith.mulf %3, %4 : vector<8x16xf32>
    %6 = vector.extract_strided_slice %0 {offsets = [0, 1], sizes = [8, 1], strides = [1, 1]} : vector<8x8xf32> to vector<8x1xf32>
    %7 = vector.broadcast %6 : vector<8x1xf32> to vector<8x16xf32>
    %8 = vector.broadcast %1 : vector<1x16xf32> to vector<8x16xf32>
    %9 = arith.mulf %7, %8 : vector<8x16xf32>
    %10 = vector.extract_strided_slice %0 {offsets = [0, 2], sizes = [8, 1], strides = [1, 1]} : vector<8x8xf32> to vector<8x1xf32>
    %11 = vector.broadcast %10 : vector<8x1xf32> to vector<8x16xf32>
    %12 = vector.broadcast %1 : vector<1x16xf32> to vector<8x16xf32>
    %13 = arith.mulf %11, %12 : vector<8x16xf32>
    %14 = vector.extract_strided_slice %0 {offsets = [0, 3], sizes = [8, 1], strides = [1, 1]} : vector<8x8xf32> to vector<8x1xf32>
    %15 = vector.broadcast %14 : vector<8x1xf32> to vector<8x16xf32>
    %16 = vector.broadcast %1 : vector<1x16xf32> to vector<8x16xf32>
    %17 = arith.mulf %15, %16 : vector<8x16xf32>
    %18 = vector.extract_strided_slice %0 {offsets = [0, 4], sizes = [8, 1], strides = [1, 1]} : vector<8x8xf32> to vector<8x1xf32>
    %19 = vector.broadcast %18 : vector<8x1xf32> to vector<8x16xf32>
    %20 = vector.broadcast %1 : vector<1x16xf32> to vector<8x16xf32>
    %21 = arith.mulf %19, %20 : vector<8x16xf32>
    %22 = vector.extract_strided_slice %0 {offsets = [0, 5], sizes = [8, 1], strides = [1, 1]} : vector<8x8xf32> to vector<8x1xf32>
    %23 = vector.broadcast %22 : vector<8x1xf32> to vector<8x16xf32>
    %24 = vector.broadcast %1 : vector<1x16xf32> to vector<8x16xf32>
    %25 = arith.mulf %23, %24 : vector<8x16xf32>
    %26 = vector.extract_strided_slice %0 {offsets = [0, 6], sizes = [8, 1], strides = [1, 1]} : vector<8x8xf32> to vector<8x1xf32>
    %27 = vector.broadcast %26 : vector<8x1xf32> to vector<8x16xf32>
    %28 = vector.broadcast %1 : vector<1x16xf32> to vector<8x16xf32>
    %29 = arith.mulf %27, %28 : vector<8x16xf32>
    %30 = vector.extract_strided_slice %0 {offsets = [0, 7], sizes = [8, 1], strides = [1, 1]} : vector<8x8xf32> to vector<8x1xf32>
    %31 = vector.broadcast %30 : vector<8x1xf32> to vector<8x16xf32>
    %32 = vector.broadcast %1 : vector<1x16xf32> to vector<8x16xf32>
    %33 = arith.mulf %31, %32 : vector<8x16xf32>
    %34 = tpu.concatenate %5, %9, %13, %17, %21, %25, %29, %33 in 1 : vector<8x16xf32>, vector<8x16xf32>, vector<8x16xf32>, vector<8x16xf32>, vector<8x16xf32>, vector<8x16xf32>, vector<8x16xf32>, vector<8x16xf32> -> vector<8x128xf32>
    %35 = math.sin %34 : vector<8x128xf32>
    %36 = math.cos %34 : vector<8x128xf32>
    %37 = tpu.concatenate %35, %36 in 1 : vector<8x128xf32>, vector<8x128xf32> -> vector<8x256xf32>
    %c0_3 = arith.constant 0 : index
    %c0_4 = arith.constant 0 : index
    %38 = vector.load %arg3[%c0_3, %c0_4] : memref<256x128xf32, #tpu.memory_space<vmem>>, vector<256x128xf32>
    %cst = arith.constant dense<0.000000e+00> : vector<8x128xf32>
    %39 = tpu.matmul %37, %38, %cst {dimension_numbers = #tpu.dot_dimension_numbers<[1], [0], [0], [1], [0, 0, 1, 1], [], []>} : vector<8x256xf32>, vector<256x128xf32>, vector<8x128xf32> -> vector<8x128xf32>
    %c0_5 = arith.constant 0 : index
    %c0_6 = arith.constant 0 : index
    %40 = vector.load %arg4[%c0_5, %c0_6] : memref<1x128xf32, #tpu.memory_space<vmem>>, vector<1x128xf32>
    %41 = vector.broadcast %40 : vector<1x128xf32> to vector<8x128xf32>
    %42 = arith.addf %39, %41 : vector<8x128xf32>
    %cst_7 = arith.constant 0.000000e+00 : f32
    %43 = vector.broadcast %cst_7 : f32 to vector<8x128xf32>
    %44 = arith.maximumf %42, %43 : vector<8x128xf32>
    %c0_8 = arith.constant 0 : index
    %c0_9 = arith.constant 0 : index
    %45 = vector.load %arg5[%c0_8, %c0_9] : memref<8x128xf32, #tpu.memory_space<vmem>>, vector<8x128xf32>
    tpu.vector_store %arg5[%c0_8, %c0_9], %44 {strides = array<i32>} : memref<8x128xf32, #tpu.memory_space<vmem>>, vector<8x128xf32>,
    return
  }
  func.func @transform_0(%arg0: i32) -> (i32, i32) {
    %c0_i32 = arith.constant 0 : i32
    %c0_i32_0 = arith.constant 0 : i32
    %c0_i32_1 = arith.constant 0 : i32
    return %c0_i32, %c0_i32_0 : i32, i32
  }
  func.func @transform_1(%arg0: i32) -> (i32, i32) {
    %c0_i32 = arith.constant 0 : i32
    %c0_i32_0 = arith.constant 0 : i32
    return %arg0, %c0_i32 : i32, i32
  }
  func.func @transform_2(%arg0: i32) -> (i32, i32) {
    %c0_i32 = arith.constant 0 : i32
    %c0_i32_0 = arith.constant 0 : i32
    %c0_i32_1 = arith.constant 0 : i32
    return %c0_i32, %c0_i32_0 : i32, i32
  }
  func.func @transform_3(%arg0: i32) -> (i32, i32) {
    %c0_i32 = arith.constant 0 : i32
    %c0_i32_0 = arith.constant 0 : i32
    %c0_i32_1 = arith.constant 0 : i32
    return %c0_i32, %c0_i32_0 : i32, i32
  }
  func.func @transform_4(%arg0: i32) -> (i32, i32) {
    %c0_i32 = arith.constant 0 : i32
    %c0_i32_0 = arith.constant 0 : i32
    return %arg0, %c0_i32 : i32, i32
  }
}

</mosaic_0001>

<bundles_post_ra>
// kernel: tpu_custom_call.1
= control target key start
LH: loop header
LB: loop body
LE: loop exit
PB: predicated region body
PF: predicated region fallthrough
CT: control target
= control target key end

     0   :  { %9 = vsyncpa [#allocation3], 0  ;;  %s829_s0 = inlined_call_operand.hbm [shape: f32[1,16], index: 0, kind: input, shape index: {}]   ;;  %s830_s1 = inlined_call_operand.hbm [shape: f32[8,8], index: 1, kind: input, shape index: {}]   ;;  %s831_s2 = inlined_call_operand.hbm [shape: f32[256,128], index: 2, kind: input, shape index: {}]   ;;  %s832_s3 = inlined_call_operand.vmem [shape: f32[1,128], index: 3, kind: input, shape index: {}]   ;;  %s833_s4 = inlined_call_operand.hbm [shape: f32[8,128], index: 4, kind: output, shape index: {}]  }
   0x1   :  { %10 = vsyncpa [#allocation6], 0 }
   0x2   :  { %11 = vsyncpa [#allocation4], 0  ;;  %s695_s15 = smov [#allocation5]   ;;  %s696_s17 = smov [#allocation2]  }
   0x3   :  { %s28_s16 = sshll.u32 %s695_s15, 4  ;;  %s18_s18 = sshll.u32 %s696_s17, 4  ;;  %s29_s16 = int_to_ptr.vmem [resolvable:$true] %s28_s16  ;;  %s19_s18 = int_to_ptr.vmem [resolvable:$true] %s18_s18 }
   0x4   :  { %s601_s21 = scalar_lea.hbm %s830_s1, 128 }
   0x5   :  { %p602_p0 = scmp.ne.s32.totalorder %s830_s1, %s601_s21  ;;  %p605_p1 = scmp.lt.u32.totalorder %s601_s21, %s830_s1 }
   0x7   :  { %p607_p2 = pnand %p605_p1, %p602_p0 }
   0x9   :  { %610 = shalt.err (!%p607_p2)
}
   0xa   :  { %s611_s26 = scalar_lea.vmem %s29_s16, 128  ;;  %p616_p4 = scmp.lt.s32.totalorder %s29_s16, %s29_s16 }
   0xb   :  { %p612_p3 = scmp.ne.s32.totalorder %s29_s16, %s611_s26  ;;  %p617_p5 = scmp.lt.s32.totalorder %s611_s26, %s611_s26 }
   0xd   :  { %p618_p6 = por %p617_p5, %p616_p4 }
   0xf   :  { %p619_p7 = pnand %p618_p6, %p612_p3 }
  0x11   :  { %622 = shalt.err (!%p619_p7)
}
  0x12   :  { %31 = dma.hbm_to_vmem [thread:$0]  %s830_s1, 128, %s29_s16, [#allocation6]  }
  0x13   :  { %s623_s5 = scalar_lea.hbm %s829_s0, 16 }
  0x14   :  { %p624_p8 = scmp.ne.s32.totalorder %s829_s0, %s623_s5  ;;  %p627_p9 = scmp.lt.u32.totalorder %s623_s5, %s829_s0 }
  0x16   :  { %p629_p10 = pnand %p627_p9, %p624_p8 }
  0x18   :  { %632 = shalt.err (!%p629_p10)
}
  0x19   :  { %s633_s10 = scalar_lea.vmem %s19_s18, 16  ;;  %s637_s11 = scalar_lea.vmem %s19_s18, 32 }
  0x1a   :  { %p634_p11 = scmp.ne.s32.totalorder %s19_s18, %s633_s10  ;;  %p638_p12 = scmp.lt.s32.totalorder %s19_s18, %s19_s18 }
  0x1b   :  { %p639_p13 = scmp.lt.s32.totalorder %s637_s11, %s633_s10 }
  0x1d   :  { %p640_p0 = por %p639_p13, %p638_p12 }
  0x1f   :  { %p641_p1 = pnand %p640_p0, %p634_p11 }
  0x21   :  { %644 = shalt.err (!%p641_p1)
}
  0x22   :  { %21 = dma.hbm_to_vmem [thread:$0]  %s829_s0, 16, %s19_s18, [#allocation3]  }
  0x23   :  { %s697_s13 = smov [#allocation7]   ;;  %s645_s17 = scalar_lea.hbm %s831_s2, 4096 }
  0x24   :  { %s37_s14 = sshll.u32 %s697_s13, 4  ;;  %p646_p2 = scmp.ne.s32.totalorder %s831_s2, %s645_s17  ;;  %s38_s14 = int_to_ptr.vmem [resolvable:$true] %s37_s14 }
  0x25   :  { %p649_p3 = scmp.lt.u32.totalorder %s645_s17, %s831_s2 }
  0x27   :  { %p651_p4 = pnand %p649_p3, %p646_p2 }
  0x29   :  { %654 = shalt.err (!%p651_p4)
}
  0x2a   :  { %s655_s23 = scalar_lea.vmem %s38_s14, 4096  ;;  %p660_p6 = scmp.lt.s32.totalorder %s38_s14, %s38_s14 }
  0x2b   :  { %p656_p5 = scmp.ne.s32.totalorder %s38_s14, %s655_s23  ;;  %p661_p7 = scmp.lt.s32.totalorder %s655_s23, %s655_s23 }
  0x2d   :  { %p662_p8 = por %p661_p7, %p660_p6 }
  0x2f   :  { %p663_p9 = pnand %p662_p8, %p656_p5 }
  0x31   :  { %666 = shalt.err (!%p663_p9)
}
  0x32   :  { %s698_s0 = smov 128   ;;  %s699_s18 = smov 8  }
  0x33   :  { %43 = dma.hbm_to_vmem [thread:$0]  %s831_s2, 4096, %s38_s14, [#allocation6], %s698_s0, %s698_s0, %s699_s18  }
  0x34   :  { %689 = dma.done.wait [#allocation3], 16  }
  0x35   :  { %690 = vsyncadd [#allocation3], 4294967280 }
  0x36   :  { %691 = dma.done.wait [#allocation6], 4224  }
  0x37   :  { %692 = vsyncadd [#allocation6], 4294963072  ;;  %v700_v0 = vmov 3   ;;  %v701_v1 = vmov 1   ;;  %v55_v2 = vld [vmem:[#allocation5] sm:$0xff]  ;;  %v702_v3 = vmov 4  }
  0x38   :  { %590 = vset.pattern.permute.xlu1 %v700_v0  ;;  %588 = vset.pattern.permute.xlu0 %v701_v1  ;;  %v703_v4 = vmov 2   ;;  %v704_v5 = vmov 5   ;;  %v705_v6 = vmov 6   ;;  %v706_v7 = vmov 7   ;;  %v783_v9 = vld [vmem:[#allocation2] ss:$0 sm:$0xff] }
  0x39   :  { %80 = vperm.xlu1 %590, %v55_v2   ;;  %70 = vperm.xlu0 %588, %v55_v2   ;;  %v707_v8 = vmov 0   ;;  %s708_s2 = smov 16   ;;  %s709_s26 = smov 48   ;;  %v369_v24 = vld [vmem:[#allocation7 + $0x80] sm:$0xff]  ;;  %v370_v25 = vld [vmem:[#allocation7 + $0x88] sm:$0xff]  ;;  %v371_v30 = vld [vmem:[#allocation7 + $0x90] sm:$0xff] }
  0x3a   :  { %s710_s27 = smov 32   ;;  %s711_s28 = smov 64   ;;  %v525_v26 = vpack.c.bf16 %v370_v25, %v369_v24  ;;  %v353_v27 = vld [vmem:[#allocation7] sm:$0xff]  ;;  %v354_v28 = vld [vmem:[#allocation7 + $0x8] sm:$0xff]  ;;  %v372_v31 = vld [vmem:[#allocation7 + $0x98] sm:$0xff]  ;;  %vm132_vm0 = vcmask 130048  }
  0x3b   :  { %s712_s29 = smov 80   ;;  %s713_s30 = smov 96   ;;  %v527_v29 = vpack.c.bf16 %v354_v28, %v353_v27  ;;  %v529_v32 = vpack.c.bf16 %v372_v31, %v371_v30  ;;  %v355_v33 = vld [vmem:[#allocation7 + $0x10] sm:$0xff]  ;;  %v356_v34 = vld [vmem:[#allocation7 + $0x18] sm:$0xff]  ;;  %v373_v36 = vld [vmem:[#allocation7 + $0xa0] sm:$0xff]  ;;  %vm134_vm1 = vcmask 261120  }
  0x3c   :  { %s714_s5 = smov 112   ;;  %526 = vmatprep.subr.bf16.mxu0 %v525_v26  ;;  %v531_v35 = vpack.c.bf16 %v356_v34, %v355_v33  ;;  %v374_v37 = vld [vmem:[#allocation7 + $0xa8] sm:$0xff]  ;;  %v357_v39 = vld [vmem:[#allocation7 + $0x20] sm:$0xff]  ;;  %v375_v42 = vld [vmem:[#allocation7 + $0xb0] sm:$0xff]  ;;  %vm136_vm2 = vcmask 392192   ;;  %vm138_vm3 = vcmask 523264  }
  0x3d   :  { %591 = vset.pattern.permute.xlu1 %v702_v3  ;;  %589 = vset.pattern.permute.xlu0 %v703_v4  ;;  %v533_v38 = vpack.c.bf16 %v374_v37, %v373_v36  ;;  %v358_v40 = vld [vmem:[#allocation7 + $0x28] sm:$0xff]  ;;  %v376_v43 = vld [vmem:[#allocation7 + $0xb8] sm:$0xff]  ;;  %v359_v45 = vld [vmem:[#allocation7 + $0x30] sm:$0xff]  ;;  %vm140_vm4 = vcmask 654336   ;;  %vm142_vm5 = vcmask 785408   ;;  %vm144_vm6 = vcmask 916480  }
  0x3e   :  { %85 = vperm.xlu1 %591, %v55_v2   ;;  %75 = vperm.xlu0 %589, %v55_v2   ;;  %v535_v41 = vpack.c.bf16 %v358_v40, %v357_v39  ;;  %v537_v44 = vpack.c.bf16 %v376_v43, %v375_v42  ;;  %v360_v46 = vld [vmem:[#allocation7 + $0x38] sm:$0xff]  ;;  %v377_v48 = vld [vmem:[#allocation7 + $0xc0] sm:$0xff]  ;;  %v378_v49 = vld [vmem:[#allocation7 + $0xc8] sm:$0xff]  ;;  %v715_v34 = vmov 683565275   ;;  %s721_s8 = smov [#allocation8]  }
  0x3f   :  { %528 = vmatpush3.bf16.msra.mxu0 %v527_v29  ;;  %v539_v47 = vpack.c.bf16 %v360_v46, %v359_v45  ;;  %v541_v50 = vpack.c.bf16 %v378_v49, %v377_v48  ;;  %v361_v51 = vld [vmem:[#allocation7 + $0x40] sm:$0xff]  ;;  %v362_v52 = vld [vmem:[#allocation7 + $0x48] sm:$0xff]  ;;  %v379_v53 = vld [vmem:[#allocation7 + $0xd0] sm:$0xff]  ;;  %v716_v36 = vmov 2475754826   ;;  %s470_s9 = sshll.u32 %s721_s8, 4  ;;  %s471_s9 = int_to_ptr.vmem [resolvable:$true] %s470_s9 }
  0x40   :  { %530 = vmatprep.subr.bf16.mxu0 %v529_v32  ;;  %v543_v54 = vpack.c.bf16 %v362_v52, %v361_v51  ;;  %v380_v55 = vld [vmem:[#allocation7 + $0xd8] sm:$0xff]  ;;  %v363_v56 = vld [vmem:[#allocation7 + $0x50] sm:$0xff]  ;;  %v381_v59 = vld [vmem:[#allocation7 + $0xe0] sm:$0xff]  ;;  %v717_v39 = vmov 2131351028   ;;  %s667_s10 = scalar_lea.vmem %s471_s9, 128  ;;  %p672_p11 = scmp.lt.s32.totalorder %s471_s9, %s471_s9 }
  0x41   :  { %v364_v57 = vld [vmem:[#allocation7 + $0x58] sm:$0xff]  ;;  %v545_v58 = vpack.c.bf16 %v380_v55, %v379_v53  ;;  %v382_v60 = vld [vmem:[#allocation7 + $0xe8] sm:$0xff]  ;;  %v365_v63 = vld [vmem:[#allocation7 + $0x60] sm:$0xff]  ;;  %v718_v42 = vmov 2102212464   ;;  %p668_p10 = scmp.ne.s32.totalorder %s471_s9, %s667_s10  ;;  %p673_p12 = scmp.lt.s32.totalorder %s667_s10, %s667_s10 }
  0x42   :  { %592 = vset.pattern.permute.xlu1 %v704_v5  ;;  %593 = vset.pattern.permute.xlu0 %v705_v6  ;;  %v547_v61 = vpack.c.bf16 %v364_v57, %v363_v56  ;;  %v549_v62 = vpack.c.bf16 %v382_v60, %v381_v59  ;;  %v366_v0 = vld [vmem:[#allocation7 + $0x68] sm:$0xff]  ;;  %v383_v1 = vld [vmem:[#allocation7 + $0xf0] sm:$0xff]  ;;  %v368_v6 = vld [vmem:[#allocation7 + $0x78] sm:$0xff]  ;;  %v719_v45 = vmov 920167782  }
  0x43   :  { %90 = vperm.xlu1 %592, %v55_v2   ;;  %95 = vperm.xlu0 %593, %v55_v2   ;;  %v551_v3 = vpack.c.bf16 %v366_v0, %v365_v63  ;;  %v367_v5 = vld [vmem:[#allocation7 + $0x70] sm:$0xff]  ;;  %v720_v48 = vmov 1326507024   ;;  %p674_p13 = por %p673_p12, %p672_p11 }
  0x44   :  { %532 = vmatpush3.bf16.msra.mxu0 %v531_v35 }
  0x45   :  { %534 = vmatprep.subr.bf16.mxu0 %v533_v38  ;;  %p675_p0 = pnand %p674_p13, %p668_p10 }
  0x47   :  { %594 = vset.pattern.permute.xlu1 %v706_v7  ;;  %596 = vset.pattern.permute.xlu0 %v706_v7  ;;  %v555_v7 = vpack.c.bf16 %v368_v6, %v367_v5 }
  0x48   :  { %100 = vperm.xlu1 %594, %v55_v2   ;;  %536 = vmatpush3.bf16.msra.mxu0 %v535_v41 }
  0x49   :  { %538 = vmatprep.subr.bf16.mxu0 %v537_v44 }
  0x4c   :  { %595 = vset.pattern.permute.xlu1 %v707_v8  ;;  %540 = vmatpush3.bf16.msra.mxu0 %v539_v47 }
  0x4d   :  { %59 = vperm.xlu1 %595, %v55_v2   ;;  %542 = vmatprep.subr.bf16.mxu0 %v541_v50  ;;  %v384_v2 = vld [vmem:[#allocation7 + $0xf8] sm:$0xff] }
  0x4e   :  { %v553_v4 = vpack.c.bf16 %v384_v2, %v383_v1 }
  0x50   :  { %544 = vmatpush3.bf16.msra.mxu0 %v543_v54 }
  0x51   :  { %546 = vmatprep.subr.bf16.mxu0 %v545_v58 }
  0x54   :  { %548 = vmatpush3.bf16.msra.mxu0 %v547_v61 }
  0x55   :  { %550 = vmatprep.subr.bf16.mxu0 %v549_v62 }
  0x58   :  { %552 = vmatpush3.bf16.msra.mxu0 %v551_v3 }
  0x59   :  { %554 = vmatprep.subr.bf16.mxu0 %v553_v4 }
  0x5c   :  { %556 = vmatpush3.bf16.msra.mxu0 %v555_v7 }
  0xb8   :  { %v81_v10 = vpop.permute.xlu1 %80  ;;  %v71_v11 = vpop.permute.xlu0 %70 }
  0xb9   :  { %v73_v12 = vmul.f32 %v783_v9, %v71_v11  ;;  %v83_v13 = vmul.f32 %v783_v9, %v81_v10 }
  0xbb   :  { %105 = vrot.lane.b32.xlu0 %v73_v12, %s708_s2 }
  0xbd   :  { %v86_v14 = vpop.permute.xlu1 %85  ;;  %v76_v15 = vpop.permute.xlu0 %75 }
  0xbe   :  { %v78_v16 = vmul.f32 %v783_v9, %v76_v15  ;;  %v88_v17 = vmul.f32 %v783_v9, %v86_v14 }
  0xbf   :  { %113 = vrot.lane.b32.xlu0 %v83_v13, %s709_s26 }
  0xc0   :  { %109 = vrot.lane.b32.xlu1 %v78_v16, %s710_s27 }
  0xc2   :  { %v91_v18 = vpop.permute.xlu1 %90  ;;  %v96_v19 = vpop.permute.xlu0 %95 }
  0xc3   :  { %v93_v20 = vmul.f32 %v783_v9, %v91_v18  ;;  %v98_v21 = vmul.f32 %v783_v9, %v96_v19 }
  0xc4   :  { %117 = vrot.lane.b32.xlu1 %v88_v17, %s711_s28 }
  0xc5   :  { %121 = vrot.lane.b32.xlu0 %v93_v20, %s712_s29 }
  0xc7   :  { %v101_v22 = vpop.permute.xlu1 %100 }
  0xc8   :  { %v103_v23 = vmul.f32 %v783_v9, %v101_v22  ;;  %125 = vrot.lane.b32.xlu1 %v98_v21, %s713_s30 }
  0xca   :  { %129 = vrot.lane.b32.xlu0 %v103_v23, %s714_s5 }
  0xcc   :  { %v60_v8 = vpop.permute.xlu1 %59 }
  0xcd   :  { %v68_v11 = vmul.f32 %v783_v9, %v60_v8 }
 0x12d   :  { %v106_v10 = vpop.permute.xlu0 %105 }
 0x12e   :  { %v133_v12 = vsel %vm132_vm0, %v68_v11, %v106_v10 }
 0x131   :  { %v114_v14 = vpop.permute.xlu0 %113 }
 0x132   :  { %v110_v13 = vpop.permute.xlu1 %109 }
 0x133   :  { %v135_v15 = vsel %vm134_vm1, %v133_v12, %v110_v13 }
 0x134   :  { %v137_v17 = vsel %vm136_vm2, %v135_v15, %v114_v14 }
 0x136   :  { %v118_v16 = vpop.permute.xlu1 %117 }
 0x137   :  { %v139_v18 = vsel %vm138_vm3, %v137_v17, %v118_v16  ;;  %v122_v19 = vpop.permute.xlu0 %121 }
 0x138   :  { %v141_v20 = vsel %vm140_vm4, %v139_v18, %v122_v19 }
 0x13a   :  { %v126_v21 = vpop.permute.xlu1 %125 }
 0x13b   :  { %v143_v22 = vsel %vm142_vm5, %v141_v20, %v126_v21 }
 0x13c   :  { %v130_v23 = vpop.permute.xlu0 %129 }
 0x13d   :  { %v793_v9 = vsel %vm144_vm6, %v143_v22, %v130_v23 }
 0x13e   :  { %v149_v24 = vand.u32 2139095040, %v793_v9  ;;  %v146_v28 = vand.u32 2147483647, %v793_v9  ;;  %vm148_vm14 = vcmp.lt.s32.totalorder %v793_v9, 0  ;;  %vm238_vm6 = vweird.f32 %v793_v9 }
 0x140   :  { %v150_v25 = vshrl.u32 %v149_v24, 23  ;;  %v153_v31 = vand.u32 8388607, %v146_v28  ;;  %vm147_vm15 = vcmp.le.f32.partialorder %v146_v28, 0.7853982 }
 0x142   :  { %v481_v26 = vadd.s32 4294967169, %v150_v25  ;;  %v154_v50 = vor.u32 8388608, %v153_v31 }
 0x144   :  { %v156_v27 = vadd.s32 1, %v481_v26  ;;  %v194_v0 = vshll.u32 %v154_v50, 8 }
 0x146   :  { %vm157_vm7 = vcmp.gt.s32.totalorder %v156_v27, 0 }
 0x147   :  { %v158_v29 = vsel %vm157_vm7, %v156_v27, 0 }
 0x148   :  { %v160_v30 = vand.u32 31, %v158_v29  ;;  %v159_v33 = vshrl.u32 %v158_v29, 5 }
 0x14a   :  { %v161_v32 = vsub.s32 32, %v160_v30  ;;  %v163_v35 = vshll.u32 %v715_v34, %v160_v30  ;;  %v166_v37 = vshll.u32 %v716_v36, %v160_v30  ;;  %v169_v41 = vshll.u32 %v717_v39, %v160_v30 }
 0x14b   :  { %v172_v44 = vshll.u32 %v718_v42, %v160_v30  ;;  %v175_v47 = vshll.u32 %v719_v45, %v160_v30  ;;  %vm178_vm8 = vcmp.lt.s32.totalorder %v159_v33, 1  ;;  %vm181_vm9 = vcmp.lt.s32.totalorder %v159_v33, 4 }
 0x14c   :  { %v164_v38 = vshrl.u32 %v716_v36, %v161_v32  ;;  %v167_v40 = vshrl.u32 %v717_v39, %v161_v32  ;;  %v170_v43 = vshrl.u32 %v718_v42, %v161_v32  ;;  %v173_v46 = vshrl.u32 %v719_v45, %v161_v32 }
 0x14d   :  { %v176_v49 = vshrl.u32 %v720_v48, %v161_v32  ;;  %v162_v59 = vshrl.u32 %v715_v34, %v161_v32  ;;  %vm180_vm10 = vcmp.lt.s32.totalorder %v159_v33, 3  ;;  %vm179_vm11 = vcmp.lt.s32.totalorder %v159_v33, 2 }
 0x14e   :  { %v165_v51 = vor.u32 %v164_v38, %v163_v35  ;;  %v168_v52 = vor.u32 %v167_v40, %v166_v37  ;;  %v171_v53 = vor.u32 %v170_v43, %v169_v41  ;;  %v174_v54 = vor.u32 %v173_v46, %v172_v44 }
 0x14f   :  { %v177_v55 = vor.u32 %v176_v49, %v175_v47 }
 0x150   :  { %v183_v56 = vsel %vm181_vm9, %v171_v53, 2102212464  ;;  %v186_v57 = vsel %vm178_vm8, %v165_v51, %v168_v52  ;;  %v190_v58 = vsel %vm178_vm8, %v168_v52, %v171_v53  ;;  %v187_v60 = vsel %vm181_vm9, %v174_v54, 920167782 }
 0x151   :  { %v191_v61 = vsel %vm181_vm9, %v177_v55, 1326507024  ;;  %v188_v62 = vsel %vm180_vm10, %v171_v53, %v187_v60  ;;  %v182_v1 = vsel %vm178_vm8, %v162_v59, %v165_v51  ;;  %v184_v2 = vsel %vm180_vm10, %v168_v52, %v183_v56 }
 0x152   :  { %v192_v63 = vsel %vm180_vm10, %v174_v54, %v191_v61  ;;  %v189_v3 = vsel %vm179_vm11, %v186_v57, %v188_v62  ;;  %v185_v10 = vsel %vm179_vm11, %v182_v1, %v184_v2 }
 0x153   :  { %v193_v4 = vsel %vm179_vm11, %v190_v58, %v192_v63  ;;  %v802_v7 = vmul.u32.u64.low %v194_v0, %v189_v3  ;;  %v803_v8 = vmul.u32.u64.high %v194_v0, %v189_v3, %v802_v7  ;;  %v201_v12 = vmul.u32 %v194_v0, %v185_v10  ;;  %v489_v58 = vld [vmem:[%s832_s3] ss:$0 sm:$0xff] }
 0x154   :  { %v799_v5 = vmul.u32.u64.low %v194_v0, %v193_v4  ;;  %v800_v6 = vmul.u32.u64.high %v194_v0, %v193_v4, %v799_v5 }
 0x155   :  { %v204_v11 = vadd.s32 1, %v803_v8 }
 0x156   :  { %vm203_vm12 = vc.u32 %v800_v6, %v802_v7  ;;  %v202_v24 = vadd.s32 %v802_v7, %v800_v6 }
 0x157   :  { %v205_v13 = vsel %vm203_vm12, %v204_v11, %v803_v8 }
 0x158   :  { %v206_v14 = vadd.s32 %v205_v13, %v201_v12 }
 0x15a   :  { %v207_v15 = vadd.s32 536870912, %v206_v14 }
 0x15c   :  { %v208_v16 = vshrl.u32 %v207_v15, 30 }
 0x15e   :  { %v209_v17 = vshll.u32 %v208_v16, 30  ;;  %v232_v37 = vsub.s32 4, %v208_v16 }
 0x160   :  { %v210_v18 = vsub.s32 %v206_v14, %v209_v17  ;;  %v233_v40 = vsel %vm148_vm14, %v232_v37, %v208_v16 }
 0x161   :  { %v235_v42 = vsel %vm147_vm15, 0, %v233_v40 }
 0x162   :  { %v212_v19 = vsub.s32 0, %v210_v18  ;;  %v239_v43 = vadd.s32 3, %v235_v42  ;;  %v343_v44 = vand.u32 3, %v235_v42 }
 0x164   :  { %v482_v20 = vmin.u32 %v212_v19, %v210_v18  ;;  %v240_v45 = vand.u32 3, %v239_v43  ;;  %vm348_vm0 = vcmp.eq.s32.totalorder %v343_v44, 2  ;;  %vm345_vm2 = vcmp.eq.s32.totalorder %v343_v44, 0 }
 0x165   :  { %vm344_vm4 = vcmp.lt.s32.totalorder %v343_v44, 2 }
 0x166   :  { %v214_v21 = vclz %v482_v20  ;;  %vm245_vm1 = vcmp.eq.s32.totalorder %v240_v45, 2  ;;  %vm242_vm3 = vcmp.eq.s32.totalorder %v240_v45, 0  ;;  %vm241_vm5 = vcmp.lt.s32.totalorder %v240_v45, 2 }
 0x168   :  { %v483_v22 = vadd.s32 4294967294, %v214_v21 }
 0x16a   :  { %vm484_vm13 = vcmp.lt.s32.totalorder %v483_v22, 0 }
 0x16b   :  { %v217_v23 = vsel %vm484_vm13, 0, %v483_v22 }
 0x16c   :  { %v218_v25 = vsub.s32 32, %v217_v23  ;;  %v222_v26 = vsub.s32 4294967266, %v217_v23  ;;  %v219_v27 = vshll.u32 %v210_v18, %v217_v23 }
 0x16e   :  { %v220_v29 = vshrl.u32 %v202_v24, %v218_v25  ;;  %v223_v30 = vadd.s32 127, %v222_v26 }
 0x170   :  { %v221_v31 = vor.u32 %v220_v29, %v219_v27  ;;  %v224_v32 = vshll.u32 %v223_v30, 23 }
 0x172   :  { %v225_v33 = vor.u32 4788187, %v224_v32  ;;  %v228_v35 = vcvt.s32.f32 %v221_v31 }
 0x174   :  { %v226_v34 = vand.u32 2147483647, %v225_v33 }
 0x176   :  { %v229_v36 = vmul.f32 %v228_v35, %v226_v34 }
 0x178   :  { %v230_v38 = vxor.u32 2147483648, %v229_v36 }
 0x17a   :  { %v231_v39 = vsel %vm148_vm14, %v230_v38, %v229_v36 }
 0x17b   :  { %v234_v41 = vsel %vm147_vm15, %v793_v9, %v231_v39 }
 0x17c   :  { %597 = vcosq.f32 %v234_v41 }
 0x17d   :  { %599 = vsinq.f32 %v234_v41 }
 0x186   :  { %v598_v46 = vpop.eup %597 }
 0x187   :  { %v600_v47 = vpop.eup %599  ;;  %v246_v48 = vxor.u32 2147483648, %v598_v46 }
 0x188   :  { %v243_v49 = vxor.u32 2147483648, %v600_v47 }
 0x189   :  { %v350_v50 = vsel %vm348_vm0, %v246_v48, %v600_v47  ;;  %v247_v28 = vsel %vm245_vm1, %v246_v48, %v600_v47 }
 0x18a   :  { %v347_v51 = vsel %vm345_vm2, %v598_v46, %v243_v49  ;;  %v244_v52 = vsel %vm242_vm3, %v598_v46, %v243_v49 }
 0x18b   :  { %v351_v53 = vsel %vm344_vm4, %v347_v51, %v350_v50  ;;  %v248_v54 = vsel %vm241_vm5, %v244_v52, %v247_v28 }
 0x18c   :  { %v352_v55 = vsel %vm238_vm6, nan, %v351_v53  ;;  %v249_v56 = vsel %vm238_vm6, nan, %v248_v54 }
 0x18d   :  { %456 = vmatprep.mubr.f32.mxu0 %v352_v55 }
 0x18e   :  { %457 = vmatmul.mubr.f32.vlgmr.msra.gmra.mrb[0].mxu0 %v249_v56 }
 0x261   :  { %v522_v57 = vpop.f32.mrb[0].mxu0 }
 0x262   :  { %v523_v59 = vpop.f32.mrb[1].mxu0 }
 0x263   :  { %v524_v60 = vadd.f32 %v523_v59, %v522_v57 }
 0x265   :  { %v459_v61 = vadd.f32 %v524_v60, %v489_v58 }
 0x267   :  { %v462_v62 = vmax.f32 %v459_v61, 0.0 }
 0x269   :  { %463 = vst [vmem:[#allocation8] sm:$0xff] %v462_v62 }
 0x26a   :  { %678 = shalt.err (!%p675_p0)
}
 0x26b   :  { %s679_s12 = scalar_lea.hbm %s833_s4, 128 }
 0x26c   :  { %p680_p1 = scmp.ne.s32.totalorder %s833_s4, %s679_s12  ;;  %p683_p2 = scmp.lt.u32.totalorder %s679_s12, %s833_s4 }
 0x26e   :  { %p685_p3 = pnand %p683_p2, %p680_p1 }
 0x270   :  { %688 = shalt.err (!%p685_p3)
}
 0x271   :  { %473 = dma.vmem_to_hbm [thread:$0]  %s471_s9, 128, %s833_s4, [#allocation4]  }
 0x272   :  { %693 = dma.done.wait [#allocation4], 128  }
 0x273   :  { %694 = vsyncadd [#allocation4], 4294967168 }
 0x274   :  { %477 = vsyncpa [#allocation3], 1 }
 0x275   :  { %478 = vsyncpa [#allocation6], 1 }
 0x276   :  { %479 = vsyncpa [#allocation4], 1 }

</bundles_post_ra>
